<compile_context>
chip_gen: v6e
topology: v6e:2x2x1
jax: 0.10.0
libtpu: 0.0.40
codegen_flags: <defaults>
</compile_context>

<pallas_src>
import functools

import jax
import jax.numpy as jnp
from jax import lax
from jax.experimental import pallas as pl
from jax.experimental.pallas import tpu as pltpu


def fused_conv_block_kernel(x_ref, w1_ref, s1_ref, b1_ref,
                            w2_ref, s2_ref, b2_ref, o_ref, pad_ref,
                            *, H, W):
    """One batch element: conv3x3+BN+ReLU twice, fully in VMEM.

    x_ref:   (1, Cin, H*W)      input image, channel-major, flat spatial
    w*_ref:  (9, Cout, Cbuf)    per-tap weight matrices (tap order ky, kx),
                                contraction dim zero-padded to Cbuf
    s*_ref:  (Cout, 1)          folded BN scale
    b*_ref:  (Cout, 1)          folded conv-bias + BN bias
    o_ref:   (1, Cout2, H*W)    output block (lane-dense, NCHW-ordered)
    pad_ref: (Cbuf, H*W + 4*W)  zero-padded flat-spatial VMEM scratch
    """
    HW = H * W
    off = 2 * W                       # image start inside the padded flat buffer
    cin = x_ref.shape[1]

    # Column-edge "keep" masks shared by both stages (f32 0/1, lane-dense).
    col = lax.broadcasted_iota(jnp.int32, (1, HW), 1) % W
    keep_l = (col != 0).astype(jnp.float32)        # for dx = -1
    keep_r = (col != (W - 1)).astype(jnp.float32)  # for dx = +1

    def stage(w_ref, s_ref, b_ref):
        xp = pad_ref[...]                          # (Cbuf, HW + 4W)
        cout = w_ref.shape[1]
        acc = jnp.zeros((cout, HW), jnp.float32)
        t = 0
        for dy in (-1, 0, 1):
            for dx in (-1, 0, 1):
                shift = dy * W + dx
                xs = xp[:, off + shift: off + shift + HW]   # (Cbuf, HW)
                if dx == -1:
                    xs = xs * keep_l               # kill column-0 wraparound
                elif dx == 1:
                    xs = xs * keep_r               # kill column-(W-1) wraparound
                acc = acc + jnp.dot(w_ref[t], xs,
                                    preferred_element_type=jnp.float32)
                t += 1
        y = acc * s_ref[...] + b_ref[...]          # fused BN affine
        return jnp.maximum(y, 0.0)                 # ReLU

    # In-kernel zero padding (no HBM pad pass). Stale data in rows beyond the
    # real channel count is harmless: the weight contraction dim is zero-padded.
    pad_ref[...] = jnp.zeros_like(pad_ref)
    pad_ref[0:cin, off:off + HW] = x_ref[0].astype(jnp.float32)

    mid = stage(w1_ref, s1_ref, b1_ref)            # (Cmid, HW), stays in VMEM
    pad_ref[0:mid.shape[0], off:off + HW] = mid
    out = stage(w2_ref, s2_ref, b2_ref)            # (Cout2, HW)
    o_ref[0] = out.astype(o_ref.dtype)


# ------------------------------ wrapper glue ---------------------------------
def _fold_bn(conv_b, gamma, beta, mean, var, eps):
    scale = gamma / jnp.sqrt(var + eps)
    bias = (conv_b - mean) * scale + beta
    c = scale.shape[0]
    return (scale.reshape(c, 1).astype(jnp.float32),
            bias.reshape(c, 1).astype(jnp.float32))


def _prep_taps(w_oihw, cbuf):
    """(Cout, Cin, 3, 3) -> (9, Cout, Cbuf) per-tap matrices, K zero-padded."""
    cout, cin = w_oihw.shape[0], w_oihw.shape[1]
    taps = jnp.transpose(w_oihw, (2, 3, 0, 1)).reshape(9, cout, cin)
    if cin < cbuf:
        taps = jnp.pad(taps, ((0, 0), (0, 0), (0, cbuf - cin)))
    return taps.astype(jnp.float32)


def conv_block_forward(x_nchw, params, eps=1e-5):
    """Full conv_block forward; input/output are NCHW like the PyTorch module."""
    N, Cin, H, W = x_nchw.shape
    Cmid = params["w1"].shape[0]
    Cout = params["w2"].shape[0]
    Cbuf = max(Cin, Cmid)
    HW = H * W

    w1 = _prep_taps(params["w1"], Cbuf)
    w2 = _prep_taps(params["w2"], Cbuf)
    s1, b1 = _fold_bn(params["b1"], params["g1"], params["be1"],
                      params["m1"], params["v1"], eps)
    s2, b2 = _fold_bn(params["b2"], params["g2"], params["be2"],
                      params["m2"], params["v2"], eps)

    x_flat = x_nchw.reshape(N, Cin, HW)            # NCHW -> (N, C, H*W), free

    kernel = functools.partial(fused_conv_block_kernel, H=H, W=W)
    out = pl.pallas_call(
        kernel,
        out_shape=jax.ShapeDtypeStruct((N, Cout, HW), x_nchw.dtype),
        grid=(N,),
        in_specs=[
            pl.BlockSpec((1, Cin, HW), lambda n: (n, 0, 0)),
            pl.BlockSpec((9, Cmid, Cbuf), lambda n: (0, 0, 0)),
            pl.BlockSpec((Cmid, 1), lambda n: (0, 0)),
            pl.BlockSpec((Cmid, 1), lambda n: (0, 0)),
            pl.BlockSpec((9, Cout, Cbuf), lambda n: (0, 0, 0)),
            pl.BlockSpec((Cout, 1), lambda n: (0, 0)),
            pl.BlockSpec((Cout, 1), lambda n: (0, 0)),
        ],
        out_specs=pl.BlockSpec((1, Cout, HW), lambda n: (n, 0, 0)),
        scratch_shapes=[pltpu.VMEM((Cbuf, HW + 4 * W), jnp.float32)],
        compiler_params=pltpu.CompilerParams(
            dimension_semantics=("parallel",)),
    )(x_flat, w1, s1, b1, w2, s2, b2)
    return out.reshape(N, Cout, H, W)              # already NCHW


# ---------------- pure-JAX reference (for correctness check) -----------------
def _ref_stage(x_nchw, w, b, g, be, m, v, eps=1e-5):
    y = lax.conv_general_dilated(
        x_nchw, w, window_strides=(1, 1), padding=((1, 1), (1, 1)),
        dimension_numbers=("NCHW", "OIHW", "NCHW"))
    y = y + b[None, :, None, None]
    y = (y - m[None, :, None, None]) / jnp.sqrt(v[None, :, None, None] + eps)
    y = y * g[None, :, None, None] + be[None, :, None, None]
    return jnp.maximum(y, 0.0)


def _ref_forward(x_nchw, p):
    y = _ref_stage(x_nchw, p["w1"], p["b1"], p["g1"], p["be1"], p["m1"], p["v1"])
    return _ref_stage(y, p["w2"], p["b2"], p["g2"], p["be2"], p["m2"], p["v2"])


if __name__ == "__main__":
    N, in_c, out_c, H, W = 2, 4, 8, 16, 16

    key = jax.random.PRNGKey(0)
    ks = jax.random.split(key, 16)
    f32 = jnp.float32
    params = {
        "w1": 0.1 * jax.random.normal(ks[0], (out_c, in_c, 3, 3), f32),
        "b1": 0.1 * jax.random.normal(ks[1], (out_c,), f32),
        "g1": 1.0 + 0.1 * jax.random.normal(ks[2], (out_c,), f32),
        "be1": 0.1 * jax.random.normal(ks[3], (out_c,), f32),
        "m1": 0.1 * jax.random.normal(ks[4], (out_c,), f32),
        "v1": jax.random.uniform(ks[5], (out_c,), f32, 0.5, 1.5),
        "w2": 0.1 * jax.random.normal(ks[6], (out_c, out_c, 3, 3), f32),
        "b2": 0.1 * jax.random.normal(ks[7], (out_c,), f32),
        "g2": 1.0 + 0.1 * jax.random.normal(ks[8], (out_c,), f32),
        "be2": 0.1 * jax.random.normal(ks[9], (out_c,), f32),
        "m2": 0.1 * jax.random.normal(ks[10], (out_c,), f32),
        "v2": jax.random.uniform(ks[11], (out_c,), f32, 0.5, 1.5),
    }

    x = jax.random.normal(ks[12], (N, in_c, H, W), f32)

    out = conv_block_forward(x, params)
    out = jax.block_until_ready(out)

    ref = jax.block_until_ready(_ref_forward(x, params))
    assert out.shape == (N, out_c, H, W)
    assert jnp.allclose(out, ref, rtol=1e-4, atol=1e-4), \
        f"max abs err {jnp.max(jnp.abs(out - ref))}"

    print("KERNEL_OK")
</pallas_src>

<mosaic_0001>
module attributes {stable_mosaic.version = 11 : i64} {
  func.func @fused_conv_block_kernel(%arg0: i32, %arg1: memref<1x4x256xf32, #tpu.memory_space<vmem>>, %arg2: memref<9x8x8xf32, #tpu.memory_space<vmem>>, %arg3: memref<8x1xf32, #tpu.memory_space<vmem>>, %arg4: memref<8x1xf32, #tpu.memory_space<vmem>>, %arg5: memref<9x8x8xf32, #tpu.memory_space<vmem>>, %arg6: memref<8x1xf32, #tpu.memory_space<vmem>>, %arg7: memref<8x1xf32, #tpu.memory_space<vmem>>, %arg8: memref<1x8x256xf32, #tpu.memory_space<vmem>>, %arg9: memref<8x320xf32, #tpu.memory_space<vmem>>) attributes {dimension_semantics = [#tpu.dimension_semantics<parallel>], iteration_bounds = array<i64: 2>, scalar_prefetch = 0 : i64, scratch_operands = 1 : i64, tpu.core_type = #tpu.core_type<tc>, window_params = [{transform_indices = @transform_0, window_bounds = array<i64: 1, 4, 256>}, {pipeline_mode = #tpu.pipeline_mode<synchronous>, transform_indices = @transform_1, window_bounds = array<i64: 9, 8, 8>}, {pipeline_mode = #tpu.pipeline_mode<synchronous>, transform_indices = @transform_2, window_bounds = array<i64: 8, 1>}, {pipeline_mode = #tpu.pipeline_mode<synchronous>, transform_indices = @transform_3, window_bounds = array<i64: 8, 1>}, {pipeline_mode = #tpu.pipeline_mode<synchronous>, transform_indices = @transform_4, window_bounds = array<i64: 9, 8, 8>}, {pipeline_mode = #tpu.pipeline_mode<synchronous>, transform_indices = @transform_5, window_bounds = array<i64: 8, 1>}, {pipeline_mode = #tpu.pipeline_mode<synchronous>, transform_indices = @transform_6, window_bounds = array<i64: 8, 1>}, {transform_indices = @transform_7, window_bounds = array<i64: 1, 8, 256>}]} {
    %0 = tpu.iota {dimensions = array<i32: 1>} : vector<1x256xi32>
    %c16_i32 = arith.constant 16 : i32
    %c0_i32 = arith.constant 0 : i32
    %1 = arith.cmpi eq, %c16_i32, %c0_i32 : i32
    %c1_i32 = arith.constant 1 : i32
    %2 = arith.select %1, %c1_i32, %c16_i32 : i32
    %3 = vector.broadcast %2 : i32 to vector<1x256xi32>
    %4 = arith.remsi %0, %3 : vector<1x256xi32>
    %c0_i32_0 = arith.constant 0 : i32
    %5 = vector.broadcast %c0_i32_0 : i32 to vector<1x256xi32>
    %6 = arith.cmpi ne, %4, %5 : vector<1x256xi32>
    %c0_i32_1 = arith.constant 0 : i32
    %7 = vector.broadcast %c0_i32_1 : i32 to vector<1x256xi32>
    %8 = arith.cmpi slt, %4, %7 : vector<1x256xi32>
    %c0_i32_2 = arith.constant 0 : i32
    %9 = arith.cmpi slt, %2, %c0_i32_2 : i32
    %10 = vector.broadcast %9 : i1 to vector<1x256xi1>
    %11 = vector.broadcast %10 : vector<1x256xi1> to vector<1x256xi1>
    %12 = arith.xori %8, %11 : vector<1x256xi1>
    %13 = arith.andi %12, %6 : vector<1x256xi1>
    %14 = vector.broadcast %2 : i32 to vector<1x256xi32>
    %15 = arith.addi %4, %14 : vector<1x256xi32>
    %16 = arith.select %13, %15, %4 : vector<1x256xi1>, vector<1x256xi32>
    %c0_i32_3 = arith.constant 0 : i32
    %17 = vector.broadcast %c0_i32_3 : i32 to vector<1x256xi32>
    %18 = arith.cmpi ne, %16, %17 : vector<1x256xi32>
    %19 = arith.extui %18 : vector<1x256xi1> to vector<1x256xi32>
    %20 = arith.sitofp %19 : vector<1x256xi32> to vector<1x256xf32>
    %c15_i32 = arith.constant 15 : i32
    %21 = vector.broadcast %c15_i32 : i32 to vector<1x256xi32>
    %22 = arith.cmpi ne, %16, %21 : vector<1x256xi32>
    %23 = arith.extui %22 : vector<1x256xi1> to vector<1x256xi32>
    %24 = arith.sitofp %23 : vector<1x256xi32> to vector<1x256xf32>
    %cst = arith.constant 0.000000e+00 : f32
    %25 = vector.broadcast %cst : f32 to vector<8x320xf32>
    %c0 = arith.constant 0 : index
    %c0_4 = arith.constant 0 : index
    %26 = vector.load %arg9[%c0, %c0_4] : memref<8x320xf32, #tpu.memory_space<vmem>>, vector<8x320xf32>
    tpu.vector_store %arg9[%c0, %c0_4], %25 {strides = array<i32>} : memref<8x320xf32, #tpu.memory_space<vmem>>, vector<8x320xf32>,
    %c0_5 = arith.constant 0 : index
    %c0_6 = arith.constant 0 : index
    %c0_7 = arith.constant 0 : index
    %27 = vector.load %arg1[%c0_5, %c0_6, %c0_7] : memref<1x4x256xf32, #tpu.memory_space<vmem>>, vector<1x4x256xf32>
    %28 = vector.shape_cast %27 : vector<1x4x256xf32> to vector<4x256xf32>
    %c0_8 = arith.constant 0 : index
    %c32 = arith.constant 32 : index
    %29 = vector.load %arg9[%c0_8, %c32] : memref<8x320xf32, #tpu.memory_space<vmem>>, vector<4x256xf32>
    tpu.vector_store %arg9[%c0_8, %c32], %28 {strides = array<i32>} : memref<8x320xf32, #tpu.memory_space<vmem>>, vector<4x256xf32>,
    %c0_9 = arith.constant 0 : index
    %c0_10 = arith.constant 0 : index
    %30 = vector.load %arg9[%c0_9, %c0_10] : memref<8x320xf32, #tpu.memory_space<vmem>>, vector<8x320xf32>
    %cst_11 = arith.constant 0.000000e+00 : f32
    %31 = vector.broadcast %cst_11 : f32 to vector<8x256xf32>
    %32 = vector.extract_strided_slice %30 {offsets = [0, 15], sizes = [8, 256], strides = [1, 1]} : vector<8x320xf32> to vector<8x256xf32>
    %33 = vector.broadcast %20 : vector<1x256xf32> to vector<8x256xf32>
    %34 = arith.mulf %32, %33 : vector<8x256xf32>
    %c0_12 = arith.constant 0 : index
    %c0_13 = arith.constant 0 : index
    %c0_14 = arith.constant 0 : index
    %35 = vector.load %arg2[%c0_12, %c0_13, %c0_14] : memref<9x8x8xf32, #tpu.memory_space<vmem>>, vector<1x8x8xf32>
    %36 = vector.shape_cast %35 : vector<1x8x8xf32> to vector<8x8xf32>
    %cst_15 = arith.constant dense<0.000000e+00> : vector<8x256xf32>
    %37 = tpu.matmul %36, %34, %cst_15 {dimension_numbers = #tpu.dot_dimension_numbers<[1], [0], [0], [1], [0, 0, 1, 1], [], []>} : vector<8x8xf32>, vector<8x256xf32>, vector<8x256xf32> -> vector<8x256xf32>
    %38 = arith.addf %31, %37 : vector<8x256xf32>
    %39 = vector.extract_strided_slice %30 {offsets = [0, 16], sizes = [8, 256], strides = [1, 1]} : vector<8x320xf32> to vector<8x256xf32>
    %c1 = arith.constant 1 : index
    %c0_16 = arith.constant 0 : index
    %c0_17 = arith.constant 0 : index
    %40 = vector.load %arg2[%c1, %c0_16, %c0_17] : memref<9x8x8xf32, #tpu.memory_space<vmem>>, vector<1x8x8xf32>
    %41 = vector.shape_cast %40 : vector<1x8x8xf32> to vector<8x8xf32>
    %cst_18 = arith.constant dense<0.000000e+00> : vector<8x256xf32>
    %42 = tpu.matmul %41, %39, %cst_18 {dimension_numbers = #tpu.dot_dimension_numbers<[1], [0], [0], [1], [0, 0, 1, 1], [], []>} : vector<8x8xf32>, vector<8x256xf32>, vector<8x256xf32> -> vector<8x256xf32>
    %43 = arith.addf %38, %42 : vector<8x256xf32>
    %44 = vector.extract_strided_slice %30 {offsets = [0, 17], sizes = [8, 256], strides = [1, 1]} : vector<8x320xf32> to vector<8x256xf32>
    %45 = vector.broadcast %24 : vector<1x256xf32> to vector<8x256xf32>
    %46 = arith.mulf %44, %45 : vector<8x256xf32>
    %c2 = arith.constant 2 : index
    %c0_19 = arith.constant 0 : index
    %c0_20 = arith.constant 0 : index
    %47 = vector.load %arg2[%c2, %c0_19, %c0_20] : memref<9x8x8xf32, #tpu.memory_space<vmem>>, vector<1x8x8xf32>
    %48 = vector.shape_cast %47 : vector<1x8x8xf32> to vector<8x8xf32>
    %cst_21 = arith.constant dense<0.000000e+00> : vector<8x256xf32>
    %49 = tpu.matmul %48, %46, %cst_21 {dimension_numbers = #tpu.dot_dimension_numbers<[1], [0], [0], [1], [0, 0, 1, 1], [], []>} : vector<8x8xf32>, vector<8x256xf32>, vector<8x256xf32> -> vector<8x256xf32>
    %50 = arith.addf %43, %49 : vector<8x256xf32>
    %51 = vector.extract_strided_slice %30 {offsets = [0, 31], sizes = [8, 256], strides = [1, 1]} : vector<8x320xf32> to vector<8x256xf32>
    %52 = vector.broadcast %20 : vector<1x256xf32> to vector<8x256xf32>
    %53 = arith.mulf %51, %52 : vector<8x256xf32>
    %c3 = arith.constant 3 : index
    %c0_22 = arith.constant 0 : index
    %c0_23 = arith.constant 0 : index
    %54 = vector.load %arg2[%c3, %c0_22, %c0_23] : memref<9x8x8xf32, #tpu.memory_space<vmem>>, vector<1x8x8xf32>
    %55 = vector.shape_cast %54 : vector<1x8x8xf32> to vector<8x8xf32>
    %cst_24 = arith.constant dense<0.000000e+00> : vector<8x256xf32>
    %56 = tpu.matmul %55, %53, %cst_24 {dimension_numbers = #tpu.dot_dimension_numbers<[1], [0], [0], [1], [0, 0, 1, 1], [], []>} : vector<8x8xf32>, vector<8x256xf32>, vector<8x256xf32> -> vector<8x256xf32>
    %57 = arith.addf %50, %56 : vector<8x256xf32>
    %58 = vector.extract_strided_slice %30 {offsets = [0, 32], sizes = [8, 256], strides = [1, 1]} : vector<8x320xf32> to vector<8x256xf32>
    %c4 = arith.constant 4 : index
    %c0_25 = arith.constant 0 : index
    %c0_26 = arith.constant 0 : index
    %59 = vector.load %arg2[%c4, %c0_25, %c0_26] : memref<9x8x8xf32, #tpu.memory_space<vmem>>, vector<1x8x8xf32>
    %60 = vector.shape_cast %59 : vector<1x8x8xf32> to vector<8x8xf32>
    %cst_27 = arith.constant dense<0.000000e+00> : vector<8x256xf32>
    %61 = tpu.matmul %60, %58, %cst_27 {dimension_numbers = #tpu.dot_dimension_numbers<[1], [0], [0], [1], [0, 0, 1, 1], [], []>} : vector<8x8xf32>, vector<8x256xf32>, vector<8x256xf32> -> vector<8x256xf32>
    %62 = arith.addf %57, %61 : vector<8x256xf32>
    %63 = vector.extract_strided_slice %30 {offsets = [0, 33], sizes = [8, 256], strides = [1, 1]} : vector<8x320xf32> to vector<8x256xf32>
    %64 = vector.broadcast %24 : vector<1x256xf32> to vector<8x256xf32>
    %65 = arith.mulf %63, %64 : vector<8x256xf32>
    %c5 = arith.constant 5 : index
    %c0_28 = arith.constant 0 : index
    %c0_29 = arith.constant 0 : index
    %66 = vector.load %arg2[%c5, %c0_28, %c0_29] : memref<9x8x8xf32, #tpu.memory_space<vmem>>, vector<1x8x8xf32>
    %67 = vector.shape_cast %66 : vector<1x8x8xf32> to vector<8x8xf32>
    %cst_30 = arith.constant dense<0.000000e+00> : vector<8x256xf32>
    %68 = tpu.matmul %67, %65, %cst_30 {dimension_numbers = #tpu.dot_dimension_numbers<[1], [0], [0], [1], [0, 0, 1, 1], [], []>} : vector<8x8xf32>, vector<8x256xf32>, vector<8x256xf32> -> vector<8x256xf32>
    %69 = arith.addf %62, %68 : vector<8x256xf32>
    %70 = vector.extract_strided_slice %30 {offsets = [0, 47], sizes = [8, 256], strides = [1, 1]} : vector<8x320xf32> to vector<8x256xf32>
    %71 = vector.broadcast %20 : vector<1x256xf32> to vector<8x256xf32>
    %72 = arith.mulf %70, %71 : vector<8x256xf32>
    %c6 = arith.constant 6 : index
    %c0_31 = arith.constant 0 : index
    %c0_32 = arith.constant 0 : index
    %73 = vector.load %arg2[%c6, %c0_31, %c0_32] : memref<9x8x8xf32, #tpu.memory_space<vmem>>, vector<1x8x8xf32>
    %74 = vector.shape_cast %73 : vector<1x8x8xf32> to vector<8x8xf32>
    %cst_33 = arith.constant dense<0.000000e+00> : vector<8x256xf32>
    %75 = tpu.matmul %74, %72, %cst_33 {dimension_numbers = #tpu.dot_dimension_numbers<[1], [0], [0], [1], [0, 0, 1, 1], [], []>} : vector<8x8xf32>, vector<8x256xf32>, vector<8x256xf32> -> vector<8x256xf32>
    %76 = arith.addf %69, %75 : vector<8x256xf32>
    %77 = vector.extract_strided_slice %30 {offsets = [0, 48], sizes = [8, 256], strides = [1, 1]} : vector<8x320xf32> to vector<8x256xf32>
    %c7 = arith.constant 7 : index
    %c0_34 = arith.constant 0 : index
    %c0_35 = arith.constant 0 : index
    %78 = vector.load %arg2[%c7, %c0_34, %c0_35] : memref<9x8x8xf32, #tpu.memory_space<vmem>>, vector<1x8x8xf32>
    %79 = vector.shape_cast %78 : vector<1x8x8xf32> to vector<8x8xf32>
    %cst_36 = arith.constant dense<0.000000e+00> : vector<8x256xf32>
    %80 = tpu.matmul %79, %77, %cst_36 {dimension_numbers = #tpu.dot_dimension_numbers<[1], [0], [0], [1], [0, 0, 1, 1], [], []>} : vector<8x8xf32>, vector<8x256xf32>, vector<8x256xf32> -> vector<8x256xf32>
    %81 = arith.addf %76, %80 : vector<8x256xf32>
    %82 = vector.extract_strided_slice %30 {offsets = [0, 49], sizes = [8, 256], strides = [1, 1]} : vector<8x320xf32> to vector<8x256xf32>
    %83 = vector.broadcast %24 : vector<1x256xf32> to vector<8x256xf32>
    %84 = arith.mulf %82, %83 : vector<8x256xf32>
    %c8 = arith.constant 8 : index
    %c0_37 = arith.constant 0 : index
    %c0_38 = arith.constant 0 : index
    %85 = vector.load %arg2[%c8, %c0_37, %c0_38] : memref<9x8x8xf32, #tpu.memory_space<vmem>>, vector<1x8x8xf32>
    %86 = vector.shape_cast %85 : vector<1x8x8xf32> to vector<8x8xf32>
    %cst_39 = arith.constant dense<0.000000e+00> : vector<8x256xf32>
    %87 = tpu.matmul %86, %84, %cst_39 {dimension_numbers = #tpu.dot_dimension_numbers<[1], [0], [0], [1], [0, 0, 1, 1], [], []>} : vector<8x8xf32>, vector<8x256xf32>, vector<8x256xf32> -> vector<8x256xf32>
    %88 = arith.addf %81, %87 : vector<8x256xf32>
    %c0_40 = arith.constant 0 : index
    %c0_41 = arith.constant 0 : index
    %89 = vector.load %arg3[%c0_40, %c0_41] : memref<8x1xf32, #tpu.memory_space<vmem>>, vector<8x1xf32>
    %90 = vector.broadcast %89 : vector<8x1xf32> to vector<8x256xf32>
    %91 = arith.mulf %88, %90 : vector<8x256xf32>
    %c0_42 = arith.constant 0 : index
    %c0_43 = arith.constant 0 : index
    %92 = vector.load %arg4[%c0_42, %c0_43] : memref<8x1xf32, #tpu.memory_space<vmem>>, vector<8x1xf32>
    %93 = vector.broadcast %92 : vector<8x1xf32> to vector<8x256xf32>
    %94 = arith.addf %91, %93 : vector<8x256xf32>
    %cst_44 = arith.constant 0.000000e+00 : f32
    %95 = vector.broadcast %cst_44 : f32 to vector<8x256xf32>
    %96 = arith.maximumf %94, %95 : vector<8x256xf32>
    %c0_45 = arith.constant 0 : index
    %c32_46 = arith.constant 32 : index
    %97 = vector.load %arg9[%c0_45, %c32_46] : memref<8x320xf32, #tpu.memory_space<vmem>>, vector<8x256xf32>
    tpu.vector_store %arg9[%c0_45, %c32_46], %96 {strides = array<i32>} : memref<8x320xf32, #tpu.memory_space<vmem>>, vector<8x256xf32>,
    %c0_47 = arith.constant 0 : index
    %c0_48 = arith.constant 0 : index
    %98 = vector.load %arg9[%c0_47, %c0_48] : memref<8x320xf32, #tpu.memory_space<vmem>>, vector<8x320xf32>
    %cst_49 = arith.constant 0.000000e+00 : f32
    %99 = vector.broadcast %cst_49 : f32 to vector<8x256xf32>
    %100 = vector.extract_strided_slice %98 {offsets = [0, 15], sizes = [8, 256], strides = [1, 1]} : vector<8x320xf32> to vector<8x256xf32>
    %101 = vector.broadcast %20 : vector<1x256xf32> to vector<8x256xf32>
    %102 = arith.mulf %100, %101 : vector<8x256xf32>
    %c0_50 = arith.constant 0 : index
    %c0_51 = arith.constant 0 : index
    %c0_52 = arith.constant 0 : index
    %103 = vector.load %arg5[%c0_50, %c0_51, %c0_52] : memref<9x8x8xf32, #tpu.memory_space<vmem>>, vector<1x8x8xf32>
    %104 = vector.shape_cast %103 : vector<1x8x8xf32> to vector<8x8xf32>
    %cst_53 = arith.constant dense<0.000000e+00> : vector<8x256xf32>
    %105 = tpu.matmul %104, %102, %cst_53 {dimension_numbers = #tpu.dot_dimension_numbers<[1], [0], [0], [1], [0, 0, 1, 1], [], []>} : vector<8x8xf32>, vector<8x256xf32>, vector<8x256xf32> -> vector<8x256xf32>
    %106 = arith.addf %99, %105 : vector<8x256xf32>
    %107 = vector.extract_strided_slice %98 {offsets = [0, 16], sizes = [8, 256], strides = [1, 1]} : vector<8x320xf32> to vector<8x256xf32>
    %c1_54 = arith.constant 1 : index
    %c0_55 = arith.constant 0 : index
    %c0_56 = arith.constant 0 : index
    %108 = vector.load %arg5[%c1_54, %c0_55, %c0_56] : memref<9x8x8xf32, #tpu.memory_space<vmem>>, vector<1x8x8xf32>
    %109 = vector.shape_cast %108 : vector<1x8x8xf32> to vector<8x8xf32>
    %cst_57 = arith.constant dense<0.000000e+00> : vector<8x256xf32>
    %110 = tpu.matmul %109, %107, %cst_57 {dimension_numbers = #tpu.dot_dimension_numbers<[1], [0], [0], [1], [0, 0, 1, 1], [], []>} : vector<8x8xf32>, vector<8x256xf32>, vector<8x256xf32> -> vector<8x256xf32>
    %111 = arith.addf %106, %110 : vector<8x256xf32>
    %112 = vector.extract_strided_slice %98 {offsets = [0, 17], sizes = [8, 256], strides = [1, 1]} : vector<8x320xf32> to vector<8x256xf32>
    %113 = vector.broadcast %24 : vector<1x256xf32> to vector<8x256xf32>
    %114 = arith.mulf %112, %113 : vector<8x256xf32>
    %c2_58 = arith.constant 2 : index
    %c0_59 = arith.constant 0 : index
    %c0_60 = arith.constant 0 : index
    %115 = vector.load %arg5[%c2_58, %c0_59, %c0_60] : memref<9x8x8xf32, #tpu.memory_space<vmem>>, vector<1x8x8xf32>
    %116 = vector.shape_cast %115 : vector<1x8x8xf32> to vector<8x8xf32>
    %cst_61 = arith.constant dense<0.000000e+00> : vector<8x256xf32>
    %117 = tpu.matmul %116, %114, %cst_61 {dimension_numbers = #tpu.dot_dimension_numbers<[1], [0], [0], [1], [0, 0, 1, 1], [], []>} : vector<8x8xf32>, vector<8x256xf32>, vector<8x256xf32> -> vector<8x256xf32>
    %118 = arith.addf %111, %117 : vector<8x256xf32>
    %119 = vector.extract_strided_slice %98 {offsets = [0, 31], sizes = [8, 256], strides = [1, 1]} : vector<8x320xf32> to vector<8x256xf32>
    %120 = vector.broadcast %20 : vector<1x256xf32> to vector<8x256xf32>
    %121 = arith.mulf %119, %120 : vector<8x256xf32>
    %c3_62 = arith.constant 3 : index
    %c0_63 = arith.constant 0 : index
    %c0_64 = arith.constant 0 : index
    %122 = vector.load %arg5[%c3_62, %c0_63, %c0_64] : memref<9x8x8xf32, #tpu.memory_space<vmem>>, vector<1x8x8xf32>
    %123 = vector.shape_cast %122 : vector<1x8x8xf32> to vector<8x8xf32>
    %cst_65 = arith.constant dense<0.000000e+00> : vector<8x256xf32>
    %124 = tpu.matmul %123, %121, %cst_65 {dimension_numbers = #tpu.dot_dimension_numbers<[1], [0], [0], [1], [0, 0, 1, 1], [], []>} : vector<8x8xf32>, vector<8x256xf32>, vector<8x256xf32> -> vector<8x256xf32>
    %125 = arith.addf %118, %124 : vector<8x256xf32>
    %126 = vector.extract_strided_slice %98 {offsets = [0, 32], sizes = [8, 256], strides = [1, 1]} : vector<8x320xf32> to vector<8x256xf32>
    %c4_66 = arith.constant 4 : index
    %c0_67 = arith.constant 0 : index
    %c0_68 = arith.constant 0 : index
    %127 = vector.load %arg5[%c4_66, %c0_67, %c0_68] : memref<9x8x8xf32, #tpu.memory_space<vmem>>, vector<1x8x8xf32>
    %128 = vector.shape_cast %127 : vector<1x8x8xf32> to vector<8x8xf32>
    %cst_69 = arith.constant dense<0.000000e+00> : vector<8x256xf32>
    %129 = tpu.matmul %128, %126, %cst_69 {dimension_numbers = #tpu.dot_dimension_numbers<[1], [0], [0], [1], [0, 0, 1, 1], [], []>} : vector<8x8xf32>, vector<8x256xf32>, vector<8x256xf32> -> vector<8x256xf32>
    %130 = arith.addf %125, %129 : vector<8x256xf32>
    %131 = vector.extract_strided_slice %98 {offsets = [0, 33], sizes = [8, 256], strides = [1, 1]} : vector<8x320xf32> to vector<8x256xf32>
    %132 = vector.broadcast %24 : vector<1x256xf32> to vector<8x256xf32>
    %133 = arith.mulf %131, %132 : vector<8x256xf32>
    %c5_70 = arith.constant 5 : index
    %c0_71 = arith.constant 0 : index
    %c0_72 = arith.constant 0 : index
    %134 = vector.load %arg5[%c5_70, %c0_71, %c0_72] : memref<9x8x8xf32, #tpu.memory_space<vmem>>, vector<1x8x8xf32>
    %135 = vector.shape_cast %134 : vector<1x8x8xf32> to vector<8x8xf32>
    %cst_73 = arith.constant dense<0.000000e+00> : vector<8x256xf32>
    %136 = tpu.matmul %135, %133, %cst_73 {dimension_numbers = #tpu.dot_dimension_numbers<[1], [0], [0], [1], [0, 0, 1, 1], [], []>} : vector<8x8xf32>, vector<8x256xf32>, vector<8x256xf32> -> vector<8x256xf32>
    %137 = arith.addf %130, %136 : vector<8x256xf32>
    %138 = vector.extract_strided_slice %98 {offsets = [0, 47], sizes = [8, 256], strides = [1, 1]} : vector<8x320xf32> to vector<8x256xf32>
    %139 = vector.broadcast %20 : vector<1x256xf32> to vector<8x256xf32>
    %140 = arith.mulf %138, %139 : vector<8x256xf32>
    %c6_74 = arith.constant 6 : index
    %c0_75 = arith.constant 0 : index
    %c0_76 = arith.constant 0 : index
    %141 = vector.load %arg5[%c6_74, %c0_75, %c0_76] : memref<9x8x8xf32, #tpu.memory_space<vmem>>, vector<1x8x8xf32>
    %142 = vector.shape_cast %141 : vector<1x8x8xf32> to vector<8x8xf32>
    %cst_77 = arith.constant dense<0.000000e+00> : vector<8x256xf32>
    %143 = tpu.matmul %142, %140, %cst_77 {dimension_numbers = #tpu.dot_dimension_numbers<[1], [0], [0], [1], [0, 0, 1, 1], [], []>} : vector<8x8xf32>, vector<8x256xf32>, vector<8x256xf32> -> vector<8x256xf32>
    %144 = arith.addf %137, %143 : vector<8x256xf32>
    %145 = vector.extract_strided_slice %98 {offsets = [0, 48], sizes = [8, 256], strides = [1, 1]} : vector<8x320xf32> to vector<8x256xf32>
    %c7_78 = arith.constant 7 : index
    %c0_79 = arith.constant 0 : index
    %c0_80 = arith.constant 0 : index
    %146 = vector.load %arg5[%c7_78, %c0_79, %c0_80] : memref<9x8x8xf32, #tpu.memory_space<vmem>>, vector<1x8x8xf32>
    %147 = vector.shape_cast %146 : vector<1x8x8xf32> to vector<8x8xf32>
    %cst_81 = arith.constant dense<0.000000e+00> : vector<8x256xf32>
    %148 = tpu.matmul %147, %145, %cst_81 {dimension_numbers = #tpu.dot_dimension_numbers<[1], [0], [0], [1], [0, 0, 1, 1], [], []>} : vector<8x8xf32>, vector<8x256xf32>, vector<8x256xf32> -> vector<8x256xf32>
    %149 = arith.addf %144, %148 : vector<8x256xf32>
    %150 = vector.extract_strided_slice %98 {offsets = [0, 49], sizes = [8, 256], strides = [1, 1]} : vector<8x320xf32> to vector<8x256xf32>
    %151 = vector.broadcast %24 : vector<1x256xf32> to vector<8x256xf32>
    %152 = arith.mulf %150, %151 : vector<8x256xf32>
    %c8_82 = arith.constant 8 : index
    %c0_83 = arith.constant 0 : index
    %c0_84 = arith.constant 0 : index
    %153 = vector.load %arg5[%c8_82, %c0_83, %c0_84] : memref<9x8x8xf32, #tpu.memory_space<vmem>>, vector<1x8x8xf32>
    %154 = vector.shape_cast %153 : vector<1x8x8xf32> to vector<8x8xf32>
    %cst_85 = arith.constant dense<0.000000e+00> : vector<8x256xf32>
    %155 = tpu.matmul %154, %152, %cst_85 {dimension_numbers = #tpu.dot_dimension_numbers<[1], [0], [0], [1], [0, 0, 1, 1], [], []>} : vector<8x8xf32>, vector<8x256xf32>, vector<8x256xf32> -> vector<8x256xf32>
    %156 = arith.addf %149, %155 : vector<8x256xf32>
    %c0_86 = arith.constant 0 : index
    %c0_87 = arith.constant 0 : index
    %157 = vector.load %arg6[%c0_86, %c0_87] : memref<8x1xf32, #tpu.memory_space<vmem>>, vector<8x1xf32>
    %158 = vector.broadcast %157 : vector<8x1xf32> to vector<8x256xf32>
    %159 = arith.mulf %156, %158 : vector<8x256xf32>
    %c0_88 = arith.constant 0 : index
    %c0_89 = arith.constant 0 : index
    %160 = vector.load %arg7[%c0_88, %c0_89] : memref<8x1xf32, #tpu.memory_space<vmem>>, vector<8x1xf32>
    %161 = vector.broadcast %160 : vector<8x1xf32> to vector<8x256xf32>
    %162 = arith.addf %159, %161 : vector<8x256xf32>
    %cst_90 = arith.constant 0.000000e+00 : f32
    %163 = vector.broadcast %cst_90 : f32 to vector<8x256xf32>
    %164 = arith.maximumf %162, %163 : vector<8x256xf32>
    %c0_91 = arith.constant 0 : index
    %c0_92 = arith.constant 0 : index
    %c0_93 = arith.constant 0 : index
    %165 = vector.load %arg8[%c0_91, %c0_92, %c0_93] : memref<1x8x256xf32, #tpu.memory_space<vmem>>, vector<1x8x256xf32>
    %166 = vector.shape_cast %165 : vector<1x8x256xf32> to vector<8x256xf32>
    %167 = vector.shape_cast %164 : vector<8x256xf32> to vector<1x8x256xf32>
    tpu.vector_store %arg8[%c0_91, %c0_92, %c0_93], %167 {strides = array<i32>} : memref<1x8x256xf32, #tpu.memory_space<vmem>>, vector<1x8x256xf32>,
    return
  }
  func.func @transform_0(%arg0: i32) -> (i32, i32, i32) {
    %c0_i32 = arith.constant 0 : i32
    %c0_i32_0 = arith.constant 0 : i32
    %c0_i32_1 = arith.constant 0 : i32
    return %arg0, %c0_i32, %c0_i32_0 : i32, i32, i32
  }
  func.func @transform_1(%arg0: i32) -> (i32, i32, i32) {
    %c0_i32 = arith.constant 0 : i32
    %c0_i32_0 = arith.constant 0 : i32
    %c0_i32_1 = arith.constant 0 : i32
    %c0_i32_2 = arith.constant 0 : i32
    return %c0_i32, %c0_i32_0, %c0_i32_1 : i32, i32, i32
  }
  func.func @transform_2(%arg0: i32) -> (i32, i32) {
    %c0_i32 = arith.constant 0 : i32
    %c0_i32_0 = arith.constant 0 : i32
    %c0_i32_1 = arith.constant 0 : i32
    return %c0_i32, %c0_i32_0 : i32, i32
  }
  func.func @transform_3(%arg0: i32) -> (i32, i32) {
    %c0_i32 = arith.constant 0 : i32
    %c0_i32_0 = arith.constant 0 : i32
    %c0_i32_1 = arith.constant 0 : i32
    return %c0_i32, %c0_i32_0 : i32, i32
  }
  func.func @transform_4(%arg0: i32) -> (i32, i32, i32) {
    %c0_i32 = arith.constant 0 : i32
    %c0_i32_0 = arith.constant 0 : i32
    %c0_i32_1 = arith.constant 0 : i32
    %c0_i32_2 = arith.constant 0 : i32
    return %c0_i32, %c0_i32_0, %c0_i32_1 : i32, i32, i32
  }
  func.func @transform_5(%arg0: i32) -> (i32, i32) {
    %c0_i32 = arith.constant 0 : i32
    %c0_i32_0 = arith.constant 0 : i32
    %c0_i32_1 = arith.constant 0 : i32
    return %c0_i32, %c0_i32_0 : i32, i32
  }
  func.func @transform_6(%arg0: i32) -> (i32, i32) {
    %c0_i32 = arith.constant 0 : i32
    %c0_i32_0 = arith.constant 0 : i32
    %c0_i32_1 = arith.constant 0 : i32
    return %c0_i32, %c0_i32_0 : i32, i32
  }
  func.func @transform_7(%arg0: i32) -> (i32, i32, i32) {
    %c0_i32 = arith.constant 0 : i32
    %c0_i32_0 = arith.constant 0 : i32
    %c0_i32_1 = arith.constant 0 : i32
    return %arg0, %c0_i32, %c0_i32_0 : i32, i32, i32
  }
}

</mosaic_0001>

<bundles_post_ra>
// kernel: tpu_custom_call.1
= control target key start
LH: loop header
LB: loop body
LE: loop exit
PB: predicated region body
PF: predicated region fallthrough
CT: control target
= control target key end

     0   :  { %12 = vsyncpa [#allocation4], 0  ;;  %s2851_s0 = inlined_call_operand.vmem [shape: f32[2,4,256], index: 0, kind: input, shape index: {}]   ;;  %s2852_s1 = inlined_call_operand.vmem [shape: f32[9,8,8], index: 1, kind: input, shape index: {}]   ;;  %s2853_s2 = inlined_call_operand.vmem [shape: f32[8,1], index: 2, kind: input, shape index: {}]   ;;  %s2854_s3 = inlined_call_operand.vmem [shape: f32[8,1], index: 3, kind: input, shape index: {}]   ;;  %s2855_s4 = inlined_call_operand.vmem [shape: f32[9,8,8], index: 4, kind: input, shape index: {}]   ;;  %s2856_s5 = inlined_call_operand.vmem [shape: f32[8,1], index: 5, kind: input, shape index: {}]   ;;  %s2857_s6 = inlined_call_operand.vmem [shape: f32[8,1], index: 6, kind: input, shape index: {}]   ;;  %s2858_s7 = inlined_call_operand.hbm [shape: f32[2,8,256], index: 7, kind: output, shape index: {}]  }
   0x1   :  { %14 = vsyncpa [#allocation4 + $0x1], 0  ;;  %s2452_s24 = smov 0   ;;  %s2454_s25 = smov 0  }
   0x2   :  { %s2456_s26 = smov 0   ;;  %s2458_s27 = smov 0  }
   0x3 LB: > { %s2473_s28 = sadd.s32 4294967295, %s2391_s27   ;;  %s2189_s29 = sadd.s32 4294967294, %s2391_s27   ;;  %s2391_s27 = sphi %s2458_s27, %s2864_s27   ;;  %s2387_s26 = sphi %s2456_s26, %s2863_s26   ;;  %s2383_s25 = sphi %s2454_s25, %s2862_s25   ;;  %s2379_s24 = sphi %s2452_s24, %s2861_s24  }
   0x4   : > { %s2477_s30 = sadd.s32 1, %s2391_s27   ;;  %s179_s8 = sadd.s32 1, %s2387_s26 }
   0x5   : > { %s176_s9 = ssub.s32 %s2391_s27, %s2477_s30  ;;  %p189_p0 = scmp.ne.s32.totalorder %s2387_s26, %s2383_s25 }
   0x6   : > { %p177_p1 = scmp.eq.s32.totalorder %s176_s9, 0  ;;  %p190_p2 = scmp.eq.s32.totalorder %s2473_s28, 1 }
   0x7   : > { %p195_p3 = scmp.ne.s32.totalorder %s2383_s25, %s2379_s24  ;;  %p196_p4 = scmp.eq.s32.totalorder %s2189_s29, 1 }
   0x8   : > { %s2488_s10 = scalar_select %p177_p1, %s2387_s26, %s179_s8  }
   0x9   : > { %p2490_p5 = por %p190_p2, %p189_p0  ;;  %p2494_p6 = por %p196_p4, %p195_p3 }
   0xa   : > { %p2192_p7 = scmp.ge.s32.totalorder %s2391_s27, 1  ;;  %p240_p8 = scmp.lt.s32.totalorder %s2391_s27, 3 }
   0xc   : > { %p241_p9 = pnand %p2192_p7, %p240_p8 }
   0xd   : > { %p272_p10 = scmp.lt.s32.totalorder (!%p241_p9), %s2473_s28, 1  ;;  %s2394_s18 = smov (!%p241_p9), 32  }
   0xe   : > { %244 = sbr.rel (%p241_p9) target bundleno = 1027 (0x403), region = 48  ;;  %s2395_s19 = smov (!%p241_p9), 15  }
   0xf   : > { %s2396_s20 = smov (!%p241_p9), 31   ;;  %s2397_s21 = smov (!%p241_p9), 17  }
  0x10   : > { %s2398_s22 = smov (!%p241_p9), 47   ;;  %s2399_s23 = smov (!%p241_p9), 33  }
  0x11   : > { %s2400_s29 = smov (!%p241_p9), 49   ;;  %s2401_s8 = smov (!%p241_p9), 112  }
  0x12   : > { %s2402_s9 = smov (!%p241_p9), 96   ;;  %s2405_s15 = smov (!%p241_p9), 81  }
  0x13   : > { %v277_v0 = vlaneseq  ;;  %vm318_vm0 = vcmask 523264   ;;  %v2393_v1 = vmov 0.0   ;;  %s273_s13 = scalar_select %p272_p10, %s2473_s28, 1  ;;  %vm332_vm5 = vcmask 1043712   ;;  %v1234_v63 = vld [vmem:[%s2853_s2] sm:$0xff] }
  0x14   : > { %316 = vst [vmem:[#allocation2] sm:$0xff] %v2393_v1  ;;  %317 = vst [vmem:[#allocation2 + $0x8] sm:$0xff] %v2393_v1  ;;  %439 = vmatprep.mubr.f32.mxu0 %v2393_v1  ;;  %527 = vmatprep.mubr.f32.mxu1 %v2393_v1  ;;  %vm327_vm6 = vcmask 261120   ;;  %vm335_vm7 = vcmask 257024   ;;  %s2406_s16 = smov 97   ;;  %vm540_vm8 = vcmask 138240  }
  0x15   : > { %319 = vst.msk [vmem:[#allocation2 + $0x10] sm:$0xff] %vm318_vm0, %v2393_v1  ;;  %v278_v2 = vand.u32 127, %v277_v0  ;;  %s2239_s14 = sshll.u32 %s273_s13, 3  ;;  %s2403_s13 = smov 111   ;;  %vm346_vm9 = vcmask 121856   ;;  %vm644_vm10 = vcmask 252928  }
  0x16   : > { %s276_s17 = scalar_lea.vmem %s2851_s0, %s2239_s14  ;;  %s2404_s14 = smov 113   ;;  %vm941_vm11 = vcmask 384000   ;;  %vm837_vm12 = vcmask 269312   ;;  %vm1134_vm13 = vcmask 400384   ;;  %v2409_v59 = vmov 0   ;;  %v1242_v0 = vld [vmem:[%s2854_s3] sm:$0xff] }
  0x17   : > { %v279_v3 = vadd.s32 128, %v278_v2  ;;  %v284_v4 = vand.u32 15, %v278_v2  ;;  %v320_v5 = vld [vmem:[%s276_s17] sm:$0xff]  ;;  %s2407_s17 = smov 95   ;;  %2328 = vset.pattern.permute.xlu1 %v2409_v59  ;;  %2329 = vset.pattern.permute.xlu0 %v2409_v59  ;;  %vm366_vm14 = vcmask 916480   ;;  %vm371_vm15 = vcmask 64512  }
  0x18   : > { %323 = vrot.lane.b32.xlu0 %v320_v5, %s2394_s18  ;;  %v322_v7 = vcombine.high %v320_v5, %v320_v5  ;;  %vm559_vm0 = vcmask 908288  }
  0x19   : > { %v291_v6 = vand.u32 15, %v279_v3  ;;  %vm304_vm1 = vcmp.ne.s32.totalorder %v284_v4, 0  ;;  %vm310_vm2 = vcmp.ne.s32.totalorder %v284_v4, 15 }
  0x1a   : > { %v2196_v8 = vsel %vm304_vm1, 1.0, %v2393_v1  ;;  %v2198_v10 = vsel %vm310_vm2, 1.0, %v2393_v1  ;;  %vm455_vm1 = vcmask 924672   ;;  %vm752_vm2 = vcmask 785408  }
  0x1b   : > { %vm305_vm3 = vcmp.ne.s32.totalorder %v291_v6, 0  ;;  %vm311_vm4 = vcmp.ne.s32.totalorder %v291_v6, 15 }
  0x1c   : > { %v2197_v9 = vsel %vm305_vm3, 1.0, %v2393_v1  ;;  %v2199_v11 = vsel %vm311_vm4, 1.0, %v2393_v1  ;;  %325 = vrot.lane.b32.xlu0 %v322_v7, %s2394_s18  ;;  %vm663_vm3 = vcmask 793600   ;;  %vm960_vm4 = vcmask 662528  }
  0x1d   : > { %v2298_v12 = vpack.i.bf16 %v2197_v9, %v2196_v8  ;;  %v2303_v13 = vpack.i.bf16 %v2199_v11, %v2198_v10 }
  0x1f   : > { %2299 = vrot.lane.b32.xlu1 %v2298_v12, %s2395_s19  ;;  %s2408_s19 = smov 80  }
  0x20   : > { %2309 = vrot.lane.b32.xlu0 %v2298_v12, %s2396_s20  ;;  %s2410_s20 = smov 79  }
  0x23   : > { %2304 = vrot.lane.b32.xlu1 %v2303_v13, %s2397_s21 }
  0x24   : > { %2319 = vrot.lane.b32.xlu0 %v2298_v12, %s2398_s22 }
  0x27   : > { %2314 = vrot.lane.b32.xlu1 %v2303_v13, %s2399_s23  ;;  %s2240_s23 = sshll.u32 %s2473_s28, 8 }
  0x2b   : > { %2324 = vrot.lane.b32.xlu1 %v2303_v13, %s2400_s29  ;;  %v2200_v13 = vld [vmem:[%s2852_s1 + $0x8] sm:$0xff] }
  0x8a   : > { %v324_v14 = vpop.permute.xlu0 %323 }
  0x8b   : > { %333 = vst.msk [vmem:[#allocation2] sm:$0xf] %vm332_vm5, %v324_v14  ;;  %vm856_vm5 = vcmask 777216  }
  0x8e   : > { %v326_v15 = vpop.permute.xlu0 %325 }
  0x8f   : > { %v328_v16 = vsel %vm327_vm6, %v324_v14, %v326_v15  ;;  %336 = vst.msk [vmem:[#allocation2 + $0x10] sm:$0xf] %vm335_vm7, %v326_v15  ;;  %vm1049_vm7 = vcmask 654336  }
  0x90   : > { %334 = vst [vmem:[#allocation2 + $0x8] sm:$0xf] %v328_v16 }
  0x91   : > { %v2300_v17 = vpop.permute.xlu1 %2299 }
  0x92   : > { %v2310_v18 = vpop.permute.xlu0 %2309  ;;  %v2517_v19 = vld [vmem:[#allocation2] sm:$0xff]  ;;  %v2521_v21 = vunpack.i.l.bf16 %v2300_v17  ;;  %v2552_v34 = vunpack.i.h.bf16 %v2300_v17 }
  0x93   : > { %360 = vrot.lane.b32.xlu0 %v2517_v19, %s2401_s8  ;;  %v2531_v25 = vunpack.i.l.bf16 %v2310_v18  ;;  %v2558_v36 = vunpack.i.h.bf16 %v2310_v18 }
  0x94   : > { %v351_v28 = vmul.f32 %v2521_v21, %v2517_v19  ;;  %v2586_v46 = vsel %vm346_vm9, %v2521_v21, %v2552_v34  ;;  %vm1262_vm9 = vcmask 1047808  }
  0x95   : > { %v2305_v20 = vpop.permute.xlu1 %2304  ;;  %v649_v30 = vmul.f32 %v2531_v25, %v2517_v19  ;;  %v2594_v49 = vsel %vm644_vm10, %v2531_v25, %v2558_v36 }
  0x96   : > { %v2523_v22 = vunpack.i.l.bf16 %v2305_v20  ;;  %v2320_v23 = vpop.permute.xlu0 %2319  ;;  %v2525_v24 = vld [vmem:[#allocation2 + $0x10] sm:$0xff]  ;;  %v2560_v37 = vunpack.i.h.bf16 %v2305_v20 }
  0x97   : > { %746 = vrot.lane.b32.xlu0 %v2517_v19, %s2402_s9  ;;  %364 = vrot.lane.b32.xlu1 %v2525_v24, %s2401_s8  ;;  %v2533_v26 = vunpack.i.l.bf16 %v2320_v23  ;;  %v338_v33 = vld [vmem:[#allocation2 + $0x8] sm:$0xff]  ;;  %v353_v38 = vmul.f32 %v2552_v34, %v2525_v24  ;;  %v2566_v39 = vunpack.i.h.bf16 %v2320_v23  ;;  %v651_v41 = vmul.f32 %v2558_v36, %v2525_v24 }
  0x98   : > { %v545_v27 = vmul.f32 %v2523_v22, %v2517_v19  ;;  %v547_v42 = vmul.f32 %v2560_v37, %v2525_v24  ;;  %v2582_v45 = vsel %vm540_vm8, %v2523_v22, %v2560_v37  ;;  %v352_v48 = vmul.f32 %v2586_v46, %v338_v33 }
  0x99   : > { %v946_v29 = vmul.f32 %v2533_v26, %v2517_v19  ;;  %v2315_v31 = vpop.permute.xlu1 %2314  ;;  %v948_v44 = vmul.f32 %v2566_v39, %v2525_v24  ;;  %v546_v47 = vmul.f32 %v2582_v45, %v338_v33  ;;  %v650_v51 = vmul.f32 %v2594_v49, %v338_v33 }
  0x9a   : > { %v2547_v32 = vunpack.i.l.bf16 %v2315_v31  ;;  %v2568_v40 = vunpack.i.h.bf16 %v2315_v31  ;;  %v2605_v54 = vsel %vm941_vm11, %v2533_v26, %v2566_v39  ;;  %vm1153_vm8 = vcmask 646144  }
  0x9b   : > { %553 = vrot.lane.b32.xlu0 %v545_v27, %s2403_s13  ;;  %449 = vrot.lane.b32.xlu1 %v351_v28, %s2404_s14  ;;  %v947_v56 = vmul.f32 %v2605_v54, %v338_v33 }
  0x9c   : > { %v842_v35 = vmul.f32 %v2547_v32, %v2517_v19  ;;  %v844_v43 = vmul.f32 %v2568_v40, %v2525_v24  ;;  %v2609_v55 = vsel %vm837_vm12, %v2547_v32, %v2568_v40 }
  0x9d   : > { %v2325_v50 = vpop.permute.xlu1 %2324  ;;  %v843_v57 = vmul.f32 %v2609_v55, %v338_v33 }
  0x9e   : > { %v2599_v52 = vunpack.i.h.bf16 %v2325_v50  ;;  %v2601_v53 = vunpack.i.l.bf16 %v2325_v50  ;;  %v2207_v50 = vld [vmem:[%s2852_s1 + $0x20] sm:$0xff] }
  0x9f   : > { %954 = vrot.lane.b32.xlu0 %v946_v29, %s2405_s15  ;;  %657 = vrot.lane.b32.xlu1 %v649_v30, %s2406_s16 }
  0xa0   : > { %v2618_v58 = vsel %vm1134_vm13, %v2601_v53, %v2599_v52  ;;  %v1139_v61 = vmul.f32 %v2601_v53, %v2517_v19  ;;  %v1141_v62 = vmul.f32 %v2599_v52, %v2525_v24 }
  0xa1   : > { %v1140_v60 = vmul.f32 %v2618_v58, %v338_v33 }
  0xa3   : > { %362 = vrot.lane.b32.xlu0 %v338_v33, %s2401_s8  ;;  %750 = vrot.lane.b32.xlu1 %v2525_v24, %s2402_s9 }
  0xa7   : > { %748 = vrot.lane.b32.xlu0 %v338_v33, %s2402_s9  ;;  %850 = vrot.lane.b32.xlu1 %v842_v35, %s2407_s17  ;;  %v2203_v35 = vld [vmem:[%s2852_s1 + $0x10] sm:$0xff] }
  0xab   : > { %453 = vrot.lane.b32.xlu0 %v353_v38, %s2404_s14  ;;  %1045 = vrot.lane.b32.xlu1 %v338_v33, %s2408_s19  ;;  %v354_v33 = vld [vmem:[%s2852_s1] sm:$0xff] }
  0xaf   : > { %661 = vrot.lane.b32.xlu0 %v651_v41, %s2406_s16  ;;  %557 = vrot.lane.b32.xlu1 %v547_v42, %s2403_s13 }
  0xb3   : > { %854 = vrot.lane.b32.xlu0 %v844_v43, %s2407_s17  ;;  %958 = vrot.lane.b32.xlu1 %v948_v44, %s2405_s15 }
  0xb7   : > { %555 = vrot.lane.b32.xlu0 %v546_v47, %s2403_s13  ;;  %451 = vrot.lane.b32.xlu1 %v352_v48, %s2404_s14  ;;  %v2205_v48 = vld [vmem:[%s2852_s1 + $0x18] sm:$0xff] }
  0xbb   : > { %1047 = vrot.lane.b32.xlu0 %v2525_v24, %s2408_s19  ;;  %659 = vrot.lane.b32.xlu1 %v650_v51, %s2406_s16 }
  0xbf   : > { %956 = vrot.lane.b32.xlu0 %v947_v56, %s2405_s15  ;;  %852 = vrot.lane.b32.xlu1 %v843_v57, %s2407_s17 }
  0xc3   : > { %1149 = vrot.lane.b32.xlu0 %v1140_v60, %s2410_s20  ;;  %1043 = vrot.lane.b32.xlu1 %v2517_v19, %s2408_s19 }
  0xc7   : > { %1147 = vrot.lane.b32.xlu0 %v1139_v61, %s2410_s20  ;;  %1151 = vrot.lane.b32.xlu1 %v1141_v62, %s2410_s20  ;;  %v2209_v62 = vld [vmem:[%s2852_s1 + $0x28] sm:$0xff] }
  0xcb   : > { %1237 = vperm.xlu1 %2328, %v1234_v63   ;;  %1245 = vperm.xlu0 %2329, %v1242_v0   ;;  %v2211_v63 = vld [vmem:[%s2852_s1 + $0x30] sm:$0xff] }
 0x105   : > { %v361_v2 = vpop.permute.xlu0 %360 }
 0x109   : > { %v365_v3 = vpop.permute.xlu1 %364  ;;  %v747_v4 = vpop.permute.xlu0 %746 }
 0x10d   : > { %v450_v5 = vpop.permute.xlu1 %449  ;;  %v554_v6 = vpop.permute.xlu0 %553 }
 0x111   : > { %v955_v7 = vpop.permute.xlu0 %954  ;;  %v658_v8 = vpop.permute.xlu1 %657 }
 0x115   : > { %v363_v9 = vpop.permute.xlu0 %362  ;;  %v751_v10 = vpop.permute.xlu1 %750 }
 0x116   : > { %v368_v11 = vsel %vm366_vm14, %v363_v9, %v365_v3  ;;  %v367_v12 = vsel %vm366_vm14, %v361_v2, %v363_v9 }
 0x117   : > { %405 = vmatprep.subr.mxu0 %v368_v11 }
 0x118   : > { %406 = vmatpush1.msra.mxu0 %v367_v12 }
 0x119   : > { %v749_v14 = vpop.permute.xlu0 %748  ;;  %v851_v15 = vpop.permute.xlu1 %850  ;;  %2201 = vmatmul.mubr.msk.f32.vlgmr.msra.gmra.mxu0 %vm371_vm15, %v2200_v13 }
 0x11a   : > { %631 = vmatprep.mubr.f32.mxu0 %v2393_v1  ;;  %v754_v38 = vsel %vm752_vm2, %v749_v14, %v751_v10  ;;  %v753_v43 = vsel %vm752_vm2, %v747_v4, %v749_v14  ;;  %v2215_v10 = vld [vmem:[%s2852_s1 + $0x40] sm:$0xff] }
 0x11d   : > { %v454_v16 = vpop.permute.xlu0 %453  ;;  %v1046_v17 = vpop.permute.xlu1 %1045 }
 0x121   : > { %v662_v18 = vpop.permute.xlu0 %661  ;;  %v558_v19 = vpop.permute.xlu1 %557 }
 0x125   : > { %v855_v20 = vpop.permute.xlu0 %854  ;;  %v959_v23 = vpop.permute.xlu1 %958 }
 0x129   : > { %v556_v24 = vpop.permute.xlu0 %555  ;;  %v452_v27 = vpop.permute.xlu1 %451 }
 0x12a   : > { %v560_v28 = vsel %vm559_vm0, %v554_v6, %v556_v24  ;;  %v457_v29 = vsel %vm455_vm1, %v452_v27, %v454_v16  ;;  %v561_v30 = vsel %vm559_vm0, %v556_v24, %v558_v19  ;;  %v456_v31 = vsel %vm455_vm1, %v450_v5, %v452_v27  ;;  %v2213_v5 = vld [vmem:[%s2852_s1 + $0x38] sm:$0xff] }
 0x12b   : > { %493 = vmatprep.subr.mxu1 %v457_v29  ;;  %597 = vmatprep.subr.mxu0 %v561_v30 }
 0x12c   : > { %494 = vmatpush1.msra.mxu1 %v456_v31  ;;  %598 = vmatpush1.msra.mxu0 %v560_v28 }
 0x12d   : > { %v1048_v41 = vpop.permute.xlu0 %1047  ;;  %2202 = vmatmul.mubr.msk.f32.vlgmr.msra.gmra.mxu1 %vm371_vm15, %v354_v33  ;;  %790 = vmatprep.subr.mxu0 %v754_v38  ;;  %v660_v42 = vpop.permute.xlu1 %659 }
 0x12e   : > { %v664_v44 = vsel %vm663_vm3, %v658_v8, %v660_v42  ;;  %2204 = vmatmul.mubr.msk.f32.vlgmr.msra.gmra.mxu0 %vm371_vm15, %v2203_v35  ;;  %v665_v47 = vsel %vm663_vm3, %v660_v42, %v662_v18  ;;  %735 = vmatprep.mubr.f32.mxu1 %v2393_v1  ;;  %v1051_v2 = vsel %vm1049_vm7, %v1046_v17, %v1048_v41 }
 0x12f   : > { %791 = vmatpush1.msra.mxu0 %v753_v43  ;;  %701 = vmatprep.subr.mxu1 %v665_v47 }
 0x130   : > { %702 = vmatpush1.msra.mxu1 %v664_v44  ;;  %824 = vmatprep.mubr.f32.mxu0 %v2393_v1 }
 0x131   : > { %v957_v51 = vpop.permute.xlu0 %956  ;;  %2206 = vmatmul.mubr.msk.f32.vlgmr.msra.gmra.mxu1 %vm371_vm15, %v2205_v48  ;;  %v853_v56 = vpop.permute.xlu1 %852 }
 0x132   : > { %v961_v57 = vsel %vm960_vm4, %v955_v7, %v957_v51  ;;  %v857_v59 = vsel %vm856_vm5, %v851_v15, %v853_v56  ;;  %2208 = vmatmul.mubr.msk.f32.vlgmr.msra.gmra.mxu0 %vm371_vm15, %v2207_v50  ;;  %v858_v60 = vsel %vm856_vm5, %v853_v56, %v855_v20  ;;  %v962_v61 = vsel %vm960_vm4, %v957_v51, %v959_v23 }
 0x133   : > { %894 = vmatprep.subr.mxu1 %v858_v60  ;;  %998 = vmatprep.subr.mxu0 %v962_v61 }
 0x134   : > { %895 = vmatpush1.msra.mxu1 %v857_v59  ;;  %928 = vmatprep.mubr.f32.mxu1 %v2393_v1 }
 0x135   : > { %999 = vmatpush1.msra.mxu0 %v961_v57  ;;  %v1150_v0 = vpop.permute.xlu0 %1149  ;;  %2210 = vmatmul.mubr.msk.f32.vlgmr.msra.gmra.mxu1 %vm371_vm15, %v2209_v62  ;;  %v1044_v3 = vpop.permute.xlu1 %1043 }
 0x136   : > { %1087 = vmatprep.subr.mxu1 %v1051_v2  ;;  %v1050_v4 = vsel %vm1049_vm7, %v1044_v3, %v1046_v17  ;;  %1032 = vmatprep.mubr.f32.mxu0 %v2393_v1 }
 0x137   : > { %2212 = vmatmul.mubr.msk.f32.vlgmr.msra.gmra.mxu0 %vm371_vm15, %v2211_v63  ;;  %1088 = vmatpush1.msra.mxu1 %v1050_v4 }
 0x138   : > { %1121 = vmatprep.mubr.f32.mxu1 %v2393_v1  ;;  %1225 = vmatprep.mubr.f32.mxu0 %v2393_v1 }
 0x139   : > { %v1148_v6 = vpop.permute.xlu0 %1147  ;;  %2214 = vmatmul.mubr.msk.f32.vlgmr.msra.gmra.mxu1 %vm371_vm15, %v2213_v5  ;;  %v1152_v7 = vpop.permute.xlu1 %1151 }
 0x13a   : > { %v1154_v8 = vsel %vm1153_vm8, %v1148_v6, %v1150_v0  ;;  %v1155_v9 = vsel %vm1153_vm8, %v1150_v0, %v1152_v7  ;;  %1355 = vmatprep.mubr.f32.mxu1 %v2393_v1 }
 0x13b   : > { %1191 = vmatprep.subr.mxu0 %v1155_v9 }
 0x13c   : > { %1192 = vmatpush1.msra.mxu0 %v1154_v8 }
 0x13d   : > { %2216 = vmatmul.mubr.msk.f32.vlgmr.msra.gmra.mxu0 %vm371_vm15, %v2215_v10 }
 0x13e   : > { %1442 = vmatprep.mubr.f32.mxu0 %v2393_v1 }
 0x146   : > { %v1238_v59 = vpop.permute.xlu1 %1237  ;;  %v1246_v63 = vpop.permute.xlu0 %1245 }
 0x1d9   : > { %v441_v11 = vpop.f32.mrf.mxu0 }
 0x1db   : > { %v443_v12 = vpop.f32.mrf.mxu0 }
 0x1ed   : > { %v529_v13 = vpop.f32.mrf.mxu1 }
 0x1ee   : > { %v530_v14 = vadd.f32 %v529_v13, %v441_v11  ;;  %v633_v15 = vpop.f32.mrf.mxu0 }
 0x1ef   : > { %v531_v16 = vpop.f32.mrf.mxu1 }
 0x1f0   : > { %v532_v17 = vadd.f32 %v531_v16, %v443_v12  ;;  %v638_v18 = vadd.f32 %v633_v15, %v530_v14  ;;  %v635_v19 = vpop.f32.mrf.mxu0 }
 0x1f1   : > { %v737_v20 = vpop.f32.mrf.mxu1 }
 0x1f2   : > { %v639_v23 = vadd.f32 %v635_v19, %v532_v17  ;;  %v742_v24 = vadd.f32 %v737_v20, %v638_v18  ;;  %v826_v27 = vpop.f32.mrf.mxu0 }
 0x1f3   : > { %v739_v28 = vpop.f32.mrf.mxu1 }
 0x1f4   : > { %v743_v29 = vadd.f32 %v739_v28, %v639_v23  ;;  %v831_v30 = vadd.f32 %v826_v27, %v742_v24  ;;  %v828_v31 = vpop.f32.mrf.mxu0 }
 0x1f5   : > { %v930_v33 = vpop.f32.mrf.mxu1 }
 0x1f6   : > { %v832_v35 = vadd.f32 %v828_v31, %v743_v29  ;;  %v935_v38 = vadd.f32 %v930_v33, %v831_v30  ;;  %v2217_v30 = vld [vmem:[%s2855_s4 + $0x8] sm:$0xff] }
 0x1f7   : > { %v932_v41 = vpop.f32.mrf.mxu1  ;;  %v1034_v42 = vpop.f32.mrf.mxu0 }
 0x1f8   : > { %v936_v43 = vadd.f32 %v932_v41, %v832_v35  ;;  %v1039_v44 = vadd.f32 %v1034_v42, %v935_v38 }
 0x1f9   : > { %v1036_v47 = vpop.f32.mrf.mxu0  ;;  %v1123_v48 = vpop.f32.mrf.mxu1 }
 0x1fa   : > { %v1040_v50 = vadd.f32 %v1036_v47, %v936_v43  ;;  %v1128_v56 = vadd.f32 %v1123_v48, %v1039_v44 }
 0x1fb   : > { %v1125_v51 = vpop.f32.mrf.mxu1 }
 0x1fc   : > { %v1129_v60 = vadd.f32 %v1125_v51, %v1040_v50 }
 0x1fd   : > { %v1227_v57 = vpop.f32.mrf.mxu0 }
 0x1fe   : > { %v1232_v61 = vadd.f32 %v1227_v57, %v1128_v56 }
 0x1ff   : > { %v1229_v62 = vpop.f32.mrf.mxu0 }
 0x200   : > { %v1233_v0 = vadd.f32 %v1229_v62, %v1129_v60  ;;  %v1240_v2 = vmul.f32 %v1238_v59, %v1232_v61  ;;  %v2220_v60 = vld [vmem:[%s2855_s4 + $0x10] sm:$0xff] }
 0x202   : > { %v1241_v3 = vmul.f32 %v1238_v59, %v1233_v0  ;;  %v1248_v4 = vadd.f32 %v1246_v63, %v1240_v2  ;;  %v1272_v59 = vld [vmem:[%s2855_s4] sm:$0xff] }
 0x204   : > { %v1249_v5 = vadd.f32 %v1246_v63, %v1241_v3  ;;  %v1250_v6 = vmax.f32 %v1248_v4, 0.0  ;;  %v2222_v4 = vld [vmem:[%s2855_s4 + $0x18] sm:$0xff] }
 0x206   : > { %1254 = vrot.lane.b32.xlu1 %v1250_v6, %s2394_s18  ;;  %v1251_v7 = vmax.f32 %v1249_v5, 0.0  ;;  %v2224_v5 = vld [vmem:[%s2855_s4 + $0x20] sm:$0xff] }
 0x20a   : > { %1256 = vrot.lane.b32.xlu1 %v1251_v7, %s2394_s18 }
 0x278   : > { %v1255_v8 = vpop.permute.xlu1 %1254 }
 0x279   : > { %1263 = vst.msk [vmem:[#allocation2] sm:$0xff] %vm1262_vm9, %v1255_v8 }
 0x27c   : > { %v1257_v9 = vpop.permute.xlu1 %1256 }
 0x27d   : > { %v1258_v10 = vsel %vm327_vm6, %v1255_v8, %v1257_v9  ;;  %1265 = vst.msk [vmem:[#allocation2 + $0x10] sm:$0xff] %vm327_vm6, %v1257_v9 }
 0x27e   : > { %1264 = vst [vmem:[#allocation2 + $0x8] sm:$0xff] %v1258_v10  ;;  %v1270_v18 = vmul.f32 %v1258_v10, %v2586_v46 }
 0x280   : > { %v1266_v11 = vld [vmem:[#allocation2] sm:$0xff] }
 0x281   : > { %1278 = vrot.lane.b32.xlu0 %v1266_v11, %s2401_s8  ;;  %v1449_v13 = vmul.f32 %v2523_v22, %v1266_v11  ;;  %v1269_v14 = vmul.f32 %v2521_v21, %v1266_v11  ;;  %v1819_v15 = vmul.f32 %v2533_v26, %v1266_v11  ;;  %v1543_v16 = vmul.f32 %v2531_v25, %v1266_v11 }
 0x282   : > { %v1725_v22 = vmul.f32 %v2547_v32, %v1266_v11 }
 0x284   : > { %v1268_v12 = vld [vmem:[#allocation2 + $0x10] sm:$0xff] }
 0x285   : > { %1639 = vrot.lane.b32.xlu0 %v1266_v11, %s2402_s9  ;;  %1282 = vrot.lane.b32.xlu1 %v1268_v12, %s2401_s8  ;;  %v1271_v21 = vmul.f32 %v2552_v34, %v1268_v12  ;;  %v1451_v25 = vmul.f32 %v2560_v37, %v1268_v12  ;;  %v1545_v26 = vmul.f32 %v2558_v36, %v1268_v12 }
 0x286   : > { %v1821_v32 = vmul.f32 %v2566_v39, %v1268_v12  ;;  %v1727_v17 = vmul.f32 %v2568_v40, %v1268_v12  ;;  %v1450_v34 = vmul.f32 %v1258_v10, %v2582_v45  ;;  %v1544_v36 = vmul.f32 %v1258_v10, %v2594_v49  ;;  %v2103_v49 = vld [vmem:[%s2857_s6] sm:$0xff] }
 0x287   : > { %v1820_v37 = vmul.f32 %v1258_v10, %v2605_v54  ;;  %v1726_v39 = vmul.f32 %v1258_v10, %v2609_v55  ;;  %v2002_v40 = vmul.f32 %v1258_v10, %v2618_v58  ;;  %v2001_v45 = vmul.f32 %v2601_v53, %v1266_v11  ;;  %v2095_v54 = vld [vmem:[%s2856_s5] sm:$0xff] }
 0x288   : > { %v2003_v46 = vmul.f32 %v2599_v52, %v1268_v12 }
 0x289   : > { %1457 = vrot.lane.b32.xlu0 %v1449_v13, %s2403_s13  ;;  %1365 = vrot.lane.b32.xlu1 %v1269_v14, %s2404_s14  ;;  %v2228_v14 = vld [vmem:[%s2855_s4 + $0x30] sm:$0xff] }
 0x28d   : > { %1827 = vrot.lane.b32.xlu0 %v1819_v15, %s2405_s15  ;;  %1551 = vrot.lane.b32.xlu1 %v1543_v16, %s2406_s16 }
 0x291   : > { %1643 = vrot.lane.b32.xlu1 %v1268_v12, %s2402_s9  ;;  %1280 = vrot.lane.b32.xlu0 %v1258_v10, %s2401_s8  ;;  %s2128_s8 = scalar_lea.hbm %s2858_s7, %s2240_s23 }
 0x295   : > { %1733 = vrot.lane.b32.xlu1 %v1725_v22, %s2407_s17  ;;  %1641 = vrot.lane.b32.xlu0 %v1258_v10, %s2402_s9 }
 0x299   : > { %1917 = vrot.lane.b32.xlu1 %v1258_v10, %s2408_s19  ;;  %1369 = vrot.lane.b32.xlu0 %v1271_v21, %s2404_s14  ;;  %v2230_v21 = vld [vmem:[%s2855_s4 + $0x38] sm:$0xff] }
 0x29d   : > { %1461 = vrot.lane.b32.xlu1 %v1451_v25, %s2403_s13  ;;  %1555 = vrot.lane.b32.xlu0 %v1545_v26, %s2406_s16 }
 0x2a1   : > { %1831 = vrot.lane.b32.xlu1 %v1821_v32, %s2405_s15  ;;  %1737 = vrot.lane.b32.xlu0 %v1727_v17, %s2407_s17 }
 0x2a5   : > { %1459 = vrot.lane.b32.xlu0 %v1450_v34, %s2403_s13  ;;  %1367 = vrot.lane.b32.xlu1 %v1270_v18, %s2404_s14  ;;  %v2232_v34 = vld [vmem:[%s2855_s4 + $0x40] sm:$0xff]  ;;  %s2411_s14 = smov [#allocation3]  }
 0x2a6   : > { %s2335_s28 = sshll.u32 %s2411_s14, 4  ;;  %s2336_s28 = int_to_ptr.vmem [resolvable:$false] %s2335_s28 }
 0x2a9   : > { %1919 = vrot.lane.b32.xlu0 %v1268_v12, %s2408_s19  ;;  %1553 = vrot.lane.b32.xlu1 %v1544_v36, %s2406_s16  ;;  %v2226_v12 = vld [vmem:[%s2855_s4 + $0x28] sm:$0xff] }
 0x2ad   : > { %1829 = vrot.lane.b32.xlu0 %v1820_v37, %s2405_s15  ;;  %1735 = vrot.lane.b32.xlu1 %v1726_v39, %s2407_s17  ;;  %s2337_s15 = scalar_lea.vmem %s2336_s28, 512 }
 0x2b1   : > { %2011 = vrot.lane.b32.xlu0 %v2002_v40, %s2410_s20  ;;  %1915 = vrot.lane.b32.xlu1 %v1266_v11, %s2408_s19  ;;  %s269_s19 = sand.u32 1, %s2383_s25  }
 0x2b2   : > { %s2116_s9 = scalar_lea.sflag [#allocation4], %s269_s19 }
 0x2b5   : > { %2009 = vrot.lane.b32.xlu0 %v2001_v45, %s2410_s20  ;;  %2013 = vrot.lane.b32.xlu1 %v2003_v46, %s2410_s20  ;;  %s2193_s20 = sshll.u32 %s269_s19, 4 }
 0x2b6   : > { %s271_s29 = scalar_lea.vmem [#allocation3], %s2193_s20 }
 0x2b7   : > { %s2130_s21 = sshll.u32 %s271_s29, 4  ;;  %s2131_s21 = int_to_ptr.vmem [resolvable:$true] %s2130_s21 }
 0x2b8   : > { %s2331_s13 = scalar_lea.vmem %s2131_s21, 256  ;;  %p2338_p0 = scmp.lt.s32.totalorder %s2131_s21, %s2336_s28 }
 0x2b9   : > { %2106 = vperm.xlu0 %2329, %v2103_v49   ;;  %2098 = vperm.xlu1 %2328, %v2095_v54   ;;  %p2332_p11 = scmp.ne.s32.totalorder %s2131_s21, %s2331_s13  ;;  %p2339_p1 = scmp.lt.s32.totalorder %s2337_s15, %s2331_s13 }
 0x2bb   : > { %p2333_p12 = pnand %p2332_p11, %p2490_p5  ;;  %p2340_p2 = por %p2339_p1, %p2338_p0 }
 0x2bd   : > { %p2334_p13 = pneg %p2333_p12 }
 0x2bf   : > { %p2341_p3 = pnand %p2340_p2, %p2334_p13 }
 0x2f3   : > { %v1279_v55 = vpop.permute.xlu0 %1278 }
 0x2f7   : > { %v1640_v58 = vpop.permute.xlu0 %1639  ;;  %v1283_v19 = vpop.permute.xlu1 %1282 }
 0x2fb   : > { %v1458_v53 = vpop.permute.xlu0 %1457  ;;  %v1366_v20 = vpop.permute.xlu1 %1365 }
 0x2ff   : > { %v1828_v52 = vpop.permute.xlu0 %1827  ;;  %v1552_v23 = vpop.permute.xlu1 %1551 }
 0x303   : > { %v1644_v24 = vpop.permute.xlu1 %1643  ;;  %v1281_v27 = vpop.permute.xlu0 %1280 }
 0x304   : > { %v1284_v28 = vsel %vm366_vm14, %v1279_v55, %v1281_v27  ;;  %v1285_v29 = vsel %vm366_vm14, %v1281_v27, %v1283_v19 }
 0x305   : > { %1321 = vmatprep.subr.mxu1 %v1285_v29 }
 0x306   : > { %1322 = vmatpush1.msra.mxu1 %v1284_v28 }
 0x307   : > { %v1734_v31 = vpop.permute.xlu1 %1733  ;;  %v1642_v33 = vpop.permute.xlu0 %1641  ;;  %2218 = vmatmul.mubr.msk.f32.vlgmr.msra.gmra.mxu1 %vm371_vm15, %v2217_v30 }
 0x308   : > { %1534 = vmatprep.mubr.f32.mxu1 %v2393_v1  ;;  %v1646_v61 = vsel %vm752_vm2, %v1642_v33, %v1644_v24  ;;  %v1645_v0 = vsel %vm752_vm2, %v1640_v58, %v1642_v33 }
 0x30b   : > { %v1918_v35 = vpop.permute.xlu1 %1917  ;;  %v1370_v38 = vpop.permute.xlu0 %1369 }
 0x30f   : > { %v1462_v41 = vpop.permute.xlu1 %1461  ;;  %v1556_v42 = vpop.permute.xlu0 %1555 }
 0x313   : > { %v1832_v43 = vpop.permute.xlu1 %1831  ;;  %v1738_v44 = vpop.permute.xlu0 %1737 }
 0x317   : > { %v1460_v47 = vpop.permute.xlu0 %1459  ;;  %v1368_v48 = vpop.permute.xlu1 %1367 }
 0x318   : > { %v1463_v50 = vsel %vm559_vm0, %v1458_v53, %v1460_v47  ;;  %v1371_v51 = vsel %vm455_vm1, %v1366_v20, %v1368_v48  ;;  %v1372_v56 = vsel %vm455_vm1, %v1368_v48, %v1370_v38  ;;  %v1464_v57 = vsel %vm559_vm0, %v1460_v47, %v1462_v41 }
 0x319   : > { %1408 = vmatprep.subr.mxu0 %v1372_v56  ;;  %1500 = vmatprep.subr.mxu1 %v1464_v57 }
 0x31a   : > { %1409 = vmatpush1.msra.mxu0 %v1371_v51  ;;  %1501 = vmatpush1.msra.mxu1 %v1463_v50 }
 0x31b   : > { %1682 = vmatprep.subr.mxu1 %v1646_v61  ;;  %v1920_v62 = vpop.permute.xlu0 %1919  ;;  %v1554_v63 = vpop.permute.xlu1 %1553  ;;  %2219 = vmatmul.mubr.msk.f32.vlgmr.msra.gmra.mxu0 %vm371_vm15, %v1272_v59 }
 0x31c   : > { %v1557_v2 = vsel %vm663_vm3, %v1552_v23, %v1554_v63  ;;  %2221 = vmatmul.mubr.msk.f32.vlgmr.msra.gmra.mxu1 %vm371_vm15, %v2220_v60  ;;  %v1558_v3 = vsel %vm663_vm3, %v1554_v63, %v1556_v42  ;;  %1628 = vmatprep.mubr.f32.mxu0 %v2393_v1  ;;  %v1922_v13 = vsel %vm1049_vm7, %v1918_v35, %v1920_v62 }
 0x31d   : > { %1683 = vmatpush1.msra.mxu1 %v1645_v0  ;;  %1594 = vmatprep.subr.mxu0 %v1558_v3 }
 0x31e   : > { %1595 = vmatpush1.msra.mxu0 %v1557_v2  ;;  %1716 = vmatprep.mubr.f32.mxu1 %v2393_v1 }
 0x31f   : > { %v1830_v6 = vpop.permute.xlu0 %1829  ;;  %v1736_v7 = vpop.permute.xlu1 %1735  ;;  %2223 = vmatmul.mubr.msk.f32.vlgmr.msra.gmra.mxu0 %vm371_vm15, %v2222_v4 }
 0x320   : > { %v1833_v8 = vsel %vm960_vm4, %v1828_v52, %v1830_v6  ;;  %v1739_v9 = vsel %vm856_vm5, %v1734_v31, %v1736_v7  ;;  %v1740_v10 = vsel %vm856_vm5, %v1736_v7, %v1738_v44  ;;  %v1834_v11 = vsel %vm960_vm4, %v1830_v6, %v1832_v43  ;;  %2225 = vmatmul.mubr.msk.f32.vlgmr.msra.gmra.mxu1 %vm371_vm15, %v2224_v5 }
 0x321   : > { %1776 = vmatprep.subr.mxu0 %v1740_v10  ;;  %1870 = vmatprep.subr.mxu1 %v1834_v11 }
 0x322   : > { %1777 = vmatpush1.msra.mxu0 %v1739_v9  ;;  %1871 = vmatpush1.msra.mxu1 %v1833_v8 }
 0x323   : > { %v2012_v15 = vpop.permute.xlu0 %2011  ;;  %1810 = vmatprep.mubr.f32.mxu0 %v2393_v1  ;;  %1958 = vmatprep.subr.mxu0 %v1922_v13  ;;  %v1916_v16 = vpop.permute.xlu1 %1915 }
 0x324   : > { %v1921_v22 = vsel %vm1049_vm7, %v1916_v16, %v1918_v35  ;;  %2227 = vmatmul.mubr.msk.f32.vlgmr.msra.gmra.mxu0 %vm371_vm15, %v2226_v12  ;;  %1904 = vmatprep.mubr.f32.mxu1 %v2393_v1 }
 0x325   : > { %1959 = vmatpush1.msra.mxu0 %v1921_v22  ;;  %2229 = vmatmul.mubr.msk.f32.vlgmr.msra.gmra.mxu1 %vm371_vm15, %v2228_v14 }
 0x326   : > { %1992 = vmatprep.mubr.f32.mxu0 %v2393_v1  ;;  %2086 = vmatprep.mubr.f32.mxu1 %v2393_v1 }
 0x327   : > { %v2010_v25 = vpop.permute.xlu0 %2009  ;;  %v2014_v26 = vpop.permute.xlu1 %2013 }
 0x328   : > { %v2015_v32 = vsel %vm1153_vm8, %v2010_v25, %v2012_v15  ;;  %2231 = vmatmul.mubr.msk.f32.vlgmr.msra.gmra.mxu0 %vm371_vm15, %v2230_v21  ;;  %v2016_v17 = vsel %vm1153_vm8, %v2012_v15, %v2014_v26 }
 0x329   : > { %2052 = vmatprep.subr.mxu1 %v2016_v17 }
 0x32a   : > { %2053 = vmatpush1.msra.mxu1 %v2015_v32 }
 0x32b   : > { %2233 = vmatmul.mubr.msk.f32.vlgmr.msra.gmra.mxu1 %vm371_vm15, %v2232_v34 }
 0x334   : > { %v2099_v50 = vpop.permute.xlu1 %2098  ;;  %v2107_v59 = vpop.permute.xlu0 %2106 }
 0x3c7   : > { %v1357_v18 = vpop.f32.mrf.mxu1 }
 0x3c9   : > { %v1359_v36 = vpop.f32.mrf.mxu1 }
 0x3db   : > { %v1444_v37 = vpop.f32.mrf.mxu0 }
 0x3dc   : > { %v1445_v1 = vadd.f32 %v1444_v37, %v1357_v18  ;;  %v1536_v39 = vpop.f32.mrf.mxu1 }
 0x3dd   : > { %v1446_v40 = vpop.f32.mrf.mxu0 }
 0x3de   : > { %v1447_v45 = vadd.f32 %v1446_v40, %v1359_v36  ;;  %v1541_v46 = vadd.f32 %v1536_v39, %v1445_v1  ;;  %v1538_v49 = vpop.f32.mrf.mxu1 }
 0x3df   : > { %v1630_v54 = vpop.f32.mrf.mxu0 }
 0x3e0   : > { %v1542_v55 = vadd.f32 %v1538_v49, %v1447_v45  ;;  %v1635_v58 = vadd.f32 %v1630_v54, %v1541_v46  ;;  %v1718_v19 = vpop.f32.mrf.mxu1 }
 0x3e1   : > { %v1632_v53 = vpop.f32.mrf.mxu0 }
 0x3e2   : > { %v1636_v20 = vadd.f32 %v1632_v53, %v1542_v55  ;;  %v1723_v52 = vadd.f32 %v1718_v19, %v1635_v58  ;;  %v1720_v23 = vpop.f32.mrf.mxu1 }
 0x3e4   : > { %v1724_v24 = vadd.f32 %v1720_v23, %v1636_v20  ;;  %v1812_v27 = vpop.f32.mrf.mxu0 }
 0x3e5   : > { %v1817_v28 = vadd.f32 %v1812_v27, %v1723_v52  ;;  %v1906_v29 = vpop.f32.mrf.mxu1 }
 0x3e6   : > { %v1814_v30 = vpop.f32.mrf.mxu0 }
 0x3e7   : > { %v1818_v31 = vadd.f32 %v1814_v30, %v1724_v24  ;;  %v1911_v33 = vadd.f32 %v1906_v29, %v1817_v28  ;;  %v1908_v35 = vpop.f32.mrf.mxu1 }
 0x3e8   : > { %v1994_v38 = vpop.f32.mrf.mxu0 }
 0x3e9   : > { %v1912_v41 = vadd.f32 %v1908_v35, %v1818_v31  ;;  %v1999_v42 = vadd.f32 %v1994_v38, %v1911_v33 }
 0x3ea   : > { %v1996_v43 = vpop.f32.mrf.mxu0 }
 0x3eb   : > { %v2088_v44 = vpop.f32.mrf.mxu1  ;;  %v2000_v47 = vadd.f32 %v1996_v43, %v1912_v41 }
 0x3ec   : > { %v2093_v48 = vadd.f32 %v2088_v44, %v1999_v42 }
 0x3ed   : > { %v2090_v51 = vpop.f32.mrf.mxu1 }
 0x3ee   : > { %v2101_v56 = vmul.f32 %v2099_v50, %v2093_v48  ;;  %v2094_v57 = vadd.f32 %v2090_v51, %v2000_v47 }
 0x3f0   : > { %v2109_v60 = vadd.f32 %v2107_v59, %v2101_v56  ;;  %v2102_v61 = vmul.f32 %v2099_v50, %v2094_v57 }
 0x3f2   : > { %v2111_v62 = vmax.f32 %v2109_v60, 0.0  ;;  %v2110_v63 = vadd.f32 %v2107_v59, %v2102_v61 }
 0x3f4   : > { %v2112_v0 = vmax.f32 %v2110_v63, 0.0  ;;  %2113 = vst [vmem:[%s271_s29] sm:$0xff] %v2111_v62 }
 0x3f6   : > { %2114 = vst [vmem:[%s271_s29 + $0x8] sm:$0xff] %v2112_v0 }
 0x3f7   : > { %2344 = shalt.err (!%p2341_p3)
}
 0x3f8   : > { %s2345_s16 = scalar_lea.hbm %s2128_s8, 256  ;;  %s2349_s20 = scalar_lea.hbm %s2858_s7, 512 }
 0x3f9   : > { %p2346_p4 = scmp.ne.s32.totalorder %s2128_s8, %s2345_s16  ;;  %p2350_p9 = scmp.lt.s32.totalorder %s2128_s8, %s2858_s7 }
 0x3fa   : > { %p2351_p10 = scmp.lt.s32.totalorder %s2349_s20, %s2345_s16 }
 0x3fb   : > { %p2347_p7 = pnand %p2346_p4, %p2490_p5 }
 0x3fc   : > { %p2352_p11 = por %p2351_p10, %p2350_p9 }
 0x3fd   : > { %p2348_p8 = pneg %p2347_p7 }
 0x3ff   : > { %p2353_p12 = pnand %p2352_p11, %p2348_p8 }
 0x401   : > { %2356 = shalt.err (!%p2353_p12)
}
 0x402   : > { %2241 = dma.vmem_to_hbm [thread:$0]  (%p2490_p5), %s2131_s21, 256, %s2128_s8, %s2116_s9  }
 0x403 PF: > { %p2247_p13 = scmp.ge.s32.totalorder %s2391_s27, 2  ;;  %s2142_s22 = sand.u32 1, %s2379_s24  }
 0x404   : > { %s2143_s18 = scalar_lea.sflag [#allocation4], %s2142_s22 }
 0x405   : > { %p2244_p0 = pnand %p2247_p13, %p2494_p6 }
 0x407   : > { %p2245_p1 = pneg %p2244_p0 }
 0x409   : > { %2374 = dma.done.wait (%p2245_p1), %s2143_s18, 256  }
 0x40a   : > { %2376 = vsyncadd (%p2245_p1), %s2143_s18, 4294967040  ;;  %p17_p2 = scmp.ge.s32.totalorder %s2477_s30, 4   ;;  %s2861_s24 = smov %s2383_s25 }
 0x40b   : > { %s2862_s25 = smov %s2387_s26  ;;  %s2863_s26 = smov %s2488_s10 }
 0x40c   : > { %s2864_s27 = smov %s2477_s30  ;;  %19 = sbr.rel (!%p17_p2) target bundleno = 3 (0x3), region = 99 }
 0x411   :  { %2148 = vsyncpa [#allocation4], 1 }
 0x412   :  { %2150 = vsyncpa [#allocation4 + $0x1], 1 }

</bundles_post_ra>
